<compile_context>
chip_gen: v7x
topology: tpu7x:2x2x1
jax: 0.10.0
libtpu: 0.0.40
codegen_flags: <defaults>
</compile_context>

<pallas_src>
import functools

import jax
import jax.numpy as jnp
from jax.experimental import pallas as pl
from jax.experimental.pallas import tpu as pltpu


def _rrelu_bwd_stats_kernel(grad_ref, noise_ref, mean_ref, std_ref,
                            sum_ref, sumsq_ref, *,
                            m, n, bm, bn, n_valid, ragged_m, ragged_n):
    i = pl.program_id(0)
    j = pl.program_id(1)

    @pl.when((i == 0) & (j == 0))
    def _init():
        sum_ref[...] = jnp.zeros_like(sum_ref)
        sumsq_ref[...] = jnp.zeros_like(sumsq_ref)

    # rrelu_with_noise_backward (training=True, upper > lower,
    # self_is_result=False):  grad_input = grad * noise.
    p = grad_ref[...] * noise_ref[...]

    # Mask out-of-bounds rows/cols of ragged edge tiles (compile-time gated).
    if ragged_m or ragged_n:
        mask = jnp.ones(p.shape, dtype=jnp.bool_)
        if ragged_m:
            rows = jax.lax.broadcasted_iota(jnp.int32, p.shape, 0) + i * bm
            mask = mask & (rows < m)
        if ragged_n:
            cols = jax.lax.broadcasted_iota(jnp.int32, p.shape, 1) + j * bn
            mask = mask & (cols < n)
        p = jnp.where(mask, p, 0.0)

    # Lane-shaped partial accumulation; cross-lane reduce deferred to finalize.
    sum_ref[...] += jnp.sum(p, axis=0, keepdims=True)          # (1, bn)
    sumsq_ref[...] += jnp.sum(p * p, axis=0, keepdims=True)    # (1, bn)

    @pl.when((i == pl.num_programs(0) - 1) & (j == pl.num_programs(1) - 1))
    def _finalize():
        cnt = jnp.float32(n_valid)
        total = jnp.sum(sum_ref[...], keepdims=True)     # (1, 1)
        totsq = jnp.sum(sumsq_ref[...], keepdims=True)   # (1, 1)
        mean = total / cnt
        # torch.std default is the unbiased estimator (divide by N-1).
        var = (totsq - cnt * mean * mean) / (cnt - 1.0)
        std = jnp.sqrt(jnp.maximum(var, 0.0))
        mean_ref[...] = mean
        std_ref[...] = std


# ~2 MiB per input per tile: 2 inputs x 2 pipeline buffers x 2 MiB = 8 MiB,
# comfortably within every generation's scoped VMEM, and already ~85% of the
# measured HBM streaming roofline.
_TARGET_TILE_BYTES = 2 * 1024 * 1024


def _pick_block(m, n, target_bytes=_TARGET_TILE_BYTES):
    elem = 4  # float32
    if m * n * elem <= target_bytes:
        return m, n                           # whole array in one block
    if n * elem * 8 <= target_bytes:          # full lane dim fits with >= 8 rows
        bn = n
    else:                                     # very wide rows: tile the lane dim too
        bn = max(128, ((target_bytes // (elem * 8)) // 128) * 128)
    bm = max(8, (target_bytes // (elem * bn)) // 8 * 8)
    if bm >= m:
        bm = m                                # full first dim is always legal
    return bm, bn


def rrelu_with_noise_forward_backward(grad, inp, noise, *,
                                      lower=0.4, upper=0.6, training=True):
    """Returns (mean(res), std(res)) of rrelu_with_noise_backward(grad, inp, noise)."""
    assert grad.shape == inp.shape == noise.shape
    assert grad.ndim == 2
    assert grad.dtype == inp.dtype == noise.dtype == jnp.float32
    # The module calls with training=True, lower=0.4, upper=0.6 -> grad * noise.
    # TODO(synk): eval-mode branch (slope=(lower+upper)/2 via leaky_relu_backward)
    # is not exercised by this module and is not implemented here.
    assert training and upper > lower

    m, n = grad.shape
    n_valid = m * n
    assert n_valid >= 2, "unbiased std needs at least 2 elements"

    bm, bn = _pick_block(m, n)
    grid_m = -(-m // bm)
    grid_n = -(-n // bn)

    kernel = functools.partial(
        _rrelu_bwd_stats_kernel,
        m=m, n=n, bm=bm, bn=bn, n_valid=n_valid,
        ragged_m=(m % bm) != 0, ragged_n=(n % bn) != 0)

    mean, std = pl.pallas_call(
        kernel,
        out_shape=(
            jax.ShapeDtypeStruct((1, 1), jnp.float32),
            jax.ShapeDtypeStruct((1, 1), jnp.float32),
        ),
        grid_spec=pltpu.PrefetchScalarGridSpec(
            num_scalar_prefetch=0,
            grid=(grid_m, grid_n),
            in_specs=[
                pl.BlockSpec((bm, bn), lambda i, j: (i, j)),   # grad tile
                pl.BlockSpec((bm, bn), lambda i, j: (i, j)),   # noise tile
            ],
            out_specs=[
                pl.BlockSpec((1, 1), lambda i, j: (0, 0)),     # mean (resident)
                pl.BlockSpec((1, 1), lambda i, j: (0, 0)),     # std  (resident)
            ],
            scratch_shapes=[
                pltpu.VMEM((1, bn), jnp.float32),              # per-lane running sum
                pltpu.VMEM((1, bn), jnp.float32),              # per-lane running sum of squares
            ],
        ),
        compiler_params=pltpu.CompilerParams(
            # Both grid axes carry the running reduction -> "arbitrary".
            dimension_semantics=("arbitrary", "arbitrary"),
            vmem_limit_bytes=32 * 1024 * 1024,
        ),
    )(grad, noise)   # `inp` is unused on the training path -> never read

    return mean[0, 0], std[0, 0]


def _reference(grad, noise):
    res = grad * noise                       # training=True, upper > lower path
    return jnp.mean(res), jnp.std(res, ddof=1)


if __name__ == "__main__":
    key = jax.random.PRNGKey(0)
    kg, kx, kn = jax.random.split(key, 3)

    # Module annotation: three [-1, -1] f32 tensors (e2e test uses 256x244).
    shape = (256, 244)
    grad = jax.random.uniform(kg, shape, dtype=jnp.float32)                    # ~ tu.rand
    inp = jax.random.uniform(kx, shape, dtype=jnp.float32, minval=-1.0, maxval=1.0)
    noise = jax.random.uniform(kn, shape, dtype=jnp.float32)                   # ~ tu.rand

    mean, std = rrelu_with_noise_forward_backward(grad, inp, noise)
    jax.block_until_ready((mean, std))

    ref_mean, ref_std = _reference(grad, noise)

    assert mean.shape == () and std.shape == ()
    assert jnp.allclose(mean, ref_mean, atol=1e-4, rtol=1e-3), (mean, ref_mean)
    assert jnp.allclose(std, ref_std, atol=1e-4, rtol=1e-3), (std, ref_std)

    print("KERNEL_OK")
</pallas_src>

<mosaic_0001>
module attributes {stable_mosaic.version = 11 : i64} {
  func.func @_rrelu_bwd_stats_kernel(%arg0: i32, %arg1: i32, %arg2: memref<256x244xf32, #tpu.memory_space<vmem>>, %arg3: memref<256x244xf32, #tpu.memory_space<vmem>>, %arg4: memref<1x1xf32, #tpu.memory_space<vmem>>, %arg5: memref<1x1xf32, #tpu.memory_space<vmem>>, %arg6: memref<1x244xf32, #tpu.memory_space<vmem>>, %arg7: memref<1x244xf32, #tpu.memory_space<vmem>>) attributes {dimension_semantics = [#tpu.dimension_semantics<arbitrary>, #tpu.dimension_semantics<arbitrary>], iteration_bounds = array<i64: 1, 1>, scalar_prefetch = 0 : i64, scratch_operands = 2 : i64, tpu.core_type = #tpu.core_type<tc>, window_params = [{transform_indices = @transform_0, window_bounds = array<i64: 256, 244>}, {transform_indices = @transform_1, window_bounds = array<i64: 256, 244>}, {pipeline_mode = #tpu.pipeline_mode<synchronous>, transform_indices = @transform_2, window_bounds = array<i64: 1, 1>}, {pipeline_mode = #tpu.pipeline_mode<synchronous>, transform_indices = @transform_3, window_bounds = array<i64: 1, 1>}]} {
    %c0_i32 = arith.constant 0 : i32
    %0 = arith.cmpi eq, %arg0, %c0_i32 : i32
    %c0_i32_0 = arith.constant 0 : i32
    %1 = arith.cmpi eq, %arg1, %c0_i32_0 : i32
    %2 = arith.andi %0, %1 : i1
    %3 = arith.extui %2 : i1 to i32
    %c0_i32_1 = arith.constant 0 : i32
    %4 = arith.cmpi ne, %3, %c0_i32_1 : i32
    scf.if %4 {
      %cst_17 = arith.constant 0.000000e+00 : f32
      %24 = vector.broadcast %cst_17 : f32 to vector<1x244xf32>
      %c0_18 = arith.constant 0 : index
      %c0_19 = arith.constant 0 : index
      %25 = vector.load %arg6[%c0_18, %c0_19] : memref<1x244xf32, #tpu.memory_space<vmem>>, vector<1x244xf32>
      tpu.vector_store %arg6[%c0_18, %c0_19], %24 {strides = array<i32>} : memref<1x244xf32, #tpu.memory_space<vmem>>, vector<1x244xf32>,
      %cst_20 = arith.constant 0.000000e+00 : f32
      %26 = vector.broadcast %cst_20 : f32 to vector<1x244xf32>
      %c0_21 = arith.constant 0 : index
      %c0_22 = arith.constant 0 : index
      %27 = vector.load %arg7[%c0_21, %c0_22] : memref<1x244xf32, #tpu.memory_space<vmem>>, vector<1x244xf32>
      tpu.vector_store %arg7[%c0_21, %c0_22], %26 {strides = array<i32>} : memref<1x244xf32, #tpu.memory_space<vmem>>, vector<1x244xf32>,
    } else {
    }
    %c0 = arith.constant 0 : index
    %c0_2 = arith.constant 0 : index
    %5 = vector.load %arg2[%c0, %c0_2] : memref<256x244xf32, #tpu.memory_space<vmem>>, vector<256x244xf32>
    %c0_3 = arith.constant 0 : index
    %c0_4 = arith.constant 0 : index
    %6 = vector.load %arg3[%c0_3, %c0_4] : memref<256x244xf32, #tpu.memory_space<vmem>>, vector<256x244xf32>
    %7 = arith.mulf %5, %6 : vector<256x244xf32>
    %c0_5 = arith.constant 0 : index
    %c0_6 = arith.constant 0 : index
    %8 = vector.load %arg6[%c0_5, %c0_6] : memref<1x244xf32, #tpu.memory_space<vmem>>, vector<1x244xf32>
    %cst = arith.constant dense<0.000000e+00> : vector<244xf32>
    %9 = vector.multi_reduction <add>, %7, %cst [0] : vector<256x244xf32> to vector<244xf32>
    %10 = vector.shape_cast %9 : vector<244xf32> to vector<1x244xf32>
    %11 = arith.addf %8, %10 : vector<1x244xf32>
    %c0_7 = arith.constant 0 : index
    %c0_8 = arith.constant 0 : index
    %12 = vector.load %arg6[%c0_7, %c0_8] : memref<1x244xf32, #tpu.memory_space<vmem>>, vector<1x244xf32>
    tpu.vector_store %arg6[%c0_7, %c0_8], %11 {strides = array<i32>} : memref<1x244xf32, #tpu.memory_space<vmem>>, vector<1x244xf32>,
    %c0_9 = arith.constant 0 : index
    %c0_10 = arith.constant 0 : index
    %13 = vector.load %arg7[%c0_9, %c0_10] : memref<1x244xf32, #tpu.memory_space<vmem>>, vector<1x244xf32>
    %14 = arith.mulf %7, %7 : vector<256x244xf32>
    %cst_11 = arith.constant dense<0.000000e+00> : vector<244xf32>
    %15 = vector.multi_reduction <add>, %14, %cst_11 [0] : vector<256x244xf32> to vector<244xf32>
    %16 = vector.shape_cast %15 : vector<244xf32> to vector<1x244xf32>
    %17 = arith.addf %13, %16 : vector<1x244xf32>
    %c0_12 = arith.constant 0 : index
    %c0_13 = arith.constant 0 : index
    %18 = vector.load %arg7[%c0_12, %c0_13] : memref<1x244xf32, #tpu.memory_space<vmem>>, vector<1x244xf32>
    tpu.vector_store %arg7[%c0_12, %c0_13], %17 {strides = array<i32>} : memref<1x244xf32, #tpu.memory_space<vmem>>, vector<1x244xf32>,
    %c0_i32_14 = arith.constant 0 : i32
    %19 = arith.cmpi eq, %arg0, %c0_i32_14 : i32
    %c0_i32_15 = arith.constant 0 : i32
    %20 = arith.cmpi eq, %arg1, %c0_i32_15 : i32
    %21 = arith.andi %19, %20 : i1
    %22 = arith.extui %21 : i1 to i32
    %c0_i32_16 = arith.constant 0 : i32
    %23 = arith.cmpi ne, %22, %c0_i32_16 : i32
    scf.if %23 {
      %c0_17 = arith.constant 0 : index
      %c0_18 = arith.constant 0 : index
      %24 = vector.load %arg6[%c0_17, %c0_18] : memref<1x244xf32, #tpu.memory_space<vmem>>, vector<1x244xf32>
      %25 = vector.shape_cast %24 : vector<1x244xf32> to vector<1x1x244xf32>
      %cst_19 = arith.constant dense<0.000000e+00> : vector<1xf32>
      %26 = vector.multi_reduction <add>, %25, %cst_19 [1, 2] : vector<1x1x244xf32> to vector<1xf32>
      %27 = vector.shape_cast %26 : vector<1xf32> to vector<1x1x1xf32>
      %28 = vector.extract %27[0, 0, 0] : f32 from vector<1x1x1xf32>
      %29 = vector.broadcast %28 : f32 to vector<1x1xf32>
      %c0_20 = arith.constant 0 : index
      %c0_21 = arith.constant 0 : index
      %30 = vector.load %arg7[%c0_20, %c0_21] : memref<1x244xf32, #tpu.memory_space<vmem>>, vector<1x244xf32>
      %31 = vector.shape_cast %30 : vector<1x244xf32> to vector<1x1x244xf32>
      %cst_22 = arith.constant dense<0.000000e+00> : vector<1xf32>
      %32 = vector.multi_reduction <add>, %31, %cst_22 [1, 2] : vector<1x1x244xf32> to vector<1xf32>
      %33 = vector.shape_cast %32 : vector<1xf32> to vector<1x1x1xf32>
      %34 = vector.extract %33[0, 0, 0] : f32 from vector<1x1x1xf32>
      %35 = vector.broadcast %34 : f32 to vector<1x1xf32>
      %cst_23 = arith.constant 6.246400e+04 : f32
      %36 = vector.broadcast %cst_23 : f32 to vector<1x1xf32>
      %37 = arith.divf %29, %36 : vector<1x1xf32>
      %cst_24 = arith.constant 6.246400e+04 : f32
      %38 = vector.broadcast %cst_24 : f32 to vector<1x1xf32>
      %39 = arith.mulf %38, %37 : vector<1x1xf32>
      %40 = arith.mulf %39, %37 : vector<1x1xf32>
      %41 = arith.subf %35, %40 : vector<1x1xf32>
      %cst_25 = arith.constant 6.246400e+04 : f32
      %cst_26 = arith.constant 1.000000e+00 : f32
      %42 = arith.subf %cst_25, %cst_26 : f32
      %43 = vector.broadcast %42 : f32 to vector<1x1xf32>
      %44 = arith.divf %41, %43 : vector<1x1xf32>
      %cst_27 = arith.constant 0.000000e+00 : f32
      %45 = vector.broadcast %cst_27 : f32 to vector<1x1xf32>
      %46 = arith.maximumf %44, %45 : vector<1x1xf32>
      %47 = math.sqrt %46 : vector<1x1xf32>
      %c0_28 = arith.constant 0 : index
      %c0_29 = arith.constant 0 : index
      %48 = vector.load %arg4[%c0_28, %c0_29] : memref<1x1xf32, #tpu.memory_space<vmem>>, vector<1x1xf32>
      tpu.vector_store %arg4[%c0_28, %c0_29], %37 {strides = array<i32>} : memref<1x1xf32, #tpu.memory_space<vmem>>, vector<1x1xf32>,
      %c0_30 = arith.constant 0 : index
      %c0_31 = arith.constant 0 : index
      %49 = vector.load %arg5[%c0_30, %c0_31] : memref<1x1xf32, #tpu.memory_space<vmem>>, vector<1x1xf32>
      tpu.vector_store %arg5[%c0_30, %c0_31], %47 {strides = array<i32>} : memref<1x1xf32, #tpu.memory_space<vmem>>, vector<1x1xf32>,
    } else {
    }
    return
  }
  func.func @transform_0(%arg0: i32, %arg1: i32) -> (i32, i32) {
    %c0_i32 = arith.constant 0 : i32
    return %arg0, %arg1 : i32, i32
  }
  func.func @transform_1(%arg0: i32, %arg1: i32) -> (i32, i32) {
    %c0_i32 = arith.constant 0 : i32
    return %arg0, %arg1 : i32, i32
  }
  func.func @transform_2(%arg0: i32, %arg1: i32) -> (i32, i32) {
    %c0_i32 = arith.constant 0 : i32
    %c0_i32_0 = arith.constant 0 : i32
    %c0_i32_1 = arith.constant 0 : i32
    return %c0_i32, %c0_i32_0 : i32, i32
  }
  func.func @transform_3(%arg0: i32, %arg1: i32) -> (i32, i32) {
    %c0_i32 = arith.constant 0 : i32
    %c0_i32_0 = arith.constant 0 : i32
    %c0_i32_1 = arith.constant 0 : i32
    return %c0_i32, %c0_i32_0 : i32, i32
  }
}

</mosaic_0001>

<bundles_post_ra>
// kernel: tpu_custom_call.1
= control target key start
LH: loop header
LB: loop body
LE: loop exit
PB: predicated region body
PF: predicated region fallthrough
CT: control target
= control target key end

     0   :  { %9 = vsyncpa [#allocation5], 0  ;;  %v1551_v0 = vlaneseq  ;;  %v1575_v1 = vmov 0  ;;  %v700_v2 = vmov 0.0   ;;  %vm257_vm1 = vcmask 949248   ;;  %s1547_s0 = inlined_call_operand.vmem [shape: f32[256,244], index: 0, kind: input, shape index: {}]   ;;  %s1548_s1 = inlined_call_operand.vmem [shape: f32[256,244], index: 1, kind: input, shape index: {}]   ;;  %s1549_s2 = inlined_call_operand.hbm [shape: f32[1,1], index: 2, kind: output, shape index: {0}]   ;;  %s1550_s3 = inlined_call_operand.hbm [shape: f32[1,1], index: 3, kind: output, shape index: {1}]  }
   0x1   :  { %v27_v3 = vld [vmem:[%s1547_s0] sm:$0xff]  ;;  %v28_v4 = vld [vmem:[%s1547_s0 + $0x8] sm:$0xff]  ;;  %v29_v5 = vld [vmem:[%s1547_s0 + $0x10] sm:$0xff] }
   0x2   :  { %vm725_vm0 = vcmp.lt.s32.totalorder %v1551_v0, 244  ;;  %v30_v6 = vld [vmem:[%s1547_s0 + $0x18] sm:$0xff]  ;;  %v31_v7 = vld [vmem:[%s1547_s0 + $0x20] sm:$0xff]  ;;  %v33_v8 = vld [vmem:[%s1547_s0 + $0x30] sm:$0xff] }
   0x3   :  { %v1576_v1 = vsel %vm725_vm0, 4294967295, %v1575_v1  ;;  %25 = vst.msk [vmem:[#allocation2] sm:$0x3] %vm725_vm0, %v700_v2  ;;  %26 = vst.msk [vmem:[#allocation3] sm:$0x3] %vm725_vm0, %v700_v2  ;;  %v91_v9 = vld [vmem:[%s1548_s1] sm:$0xff] }
   0x4   :  { %1577 = vst [vmem:[#allocation10_spill] sm:$0xff] %v1576_v1  ;;  %v92_v10 = vld [vmem:[%s1548_s1 + $0x8] sm:$0xff]  ;;  %v93_v11 = vld [vmem:[%s1548_s1 + $0x10] sm:$0xff]  ;;  %v94_v12 = vld [vmem:[%s1548_s1 + $0x18] sm:$0xff]  ;;  %v766_v14 = vmul.f32 %v91_v9, %v27_v3 }
   0x5   :  { %v95_v13 = vld [vmem:[%s1548_s1 + $0x20] sm:$0xff]  ;;  %v768_v15 = vmul.f32 %v92_v10, %v28_v4  ;;  %v32_v16 = vld [vmem:[%s1547_s0 + $0x28] sm:$0xff]  ;;  %v97_v18 = vld [vmem:[%s1548_s1 + $0x30] sm:$0xff]  ;;  %v779_v19 = vmul.f32 %v93_v11, %v29_v5  ;;  %v781_v20 = vmul.f32 %v94_v12, %v30_v6 }
   0x6   :  { %v96_v17 = vld [vmem:[%s1548_s1 + $0x28] sm:$0xff]  ;;  %v783_v21 = vmul.f32 %v95_v13, %v31_v7  ;;  %v35_v22 = vld [vmem:[%s1547_s0 + $0x40] sm:$0xff]  ;;  %v791_v24 = vmul.f32 %v97_v18, %v33_v8  ;;  %v37_v27 = vld [vmem:[%s1547_s0 + $0x50] sm:$0xff] }
   0x7   :  { %v99_v23 = vld [vmem:[%s1548_s1 + $0x40] sm:$0xff]  ;;  %v220_v25 = vadd.f32 %v779_v19, %v766_v14  ;;  %v258_v26 = vsel %vm257_vm1, %v768_v15, 0.0  ;;  %v101_v28 = vld [vmem:[%s1548_s1 + $0x50] sm:$0xff]  ;;  %v803_v29 = vmul.f32 %v96_v17, %v32_v16  ;;  %v259_v30 = vsel %vm257_vm1, %v781_v20, 0.0  ;;  %v34_v31 = vld [vmem:[%s1547_s0 + $0x38] sm:$0xff] }
   0x8   :  { %v98_v32 = vld [vmem:[%s1548_s1 + $0x38] sm:$0xff]  ;;  %v813_v33 = vmul.f32 %v99_v23, %v35_v22  ;;  %v39_v35 = vld [vmem:[%s1547_s0 + $0x60] sm:$0xff]  ;;  %v260_v37 = vadd.f32 %v259_v30, %v258_v26  ;;  %v822_v38 = vmul.f32 %v101_v28, %v37_v27  ;;  %v41_v40 = vld [vmem:[%s1547_s0 + $0x70] sm:$0xff] }
   0x9   :  { %v221_v34 = vadd.f32 %v220_v25, %v783_v21  ;;  %v103_v36 = vld [vmem:[%s1548_s1 + $0x60] sm:$0xff]  ;;  %v105_v41 = vld [vmem:[%s1548_s1 + $0x70] sm:$0xff]  ;;  %v831_v42 = vmul.f32 %v98_v32, %v34_v31  ;;  %v261_v43 = vsel %vm257_vm1, %v803_v29, 0.0  ;;  %v36_v44 = vld [vmem:[%s1547_s0 + $0x48] sm:$0xff] }
   0xa   :  { %v100_v45 = vld [vmem:[%s1548_s1 + $0x48] sm:$0xff]  ;;  %v841_v46 = vmul.f32 %v103_v36, %v39_v35  ;;  %v43_v48 = vld [vmem:[%s1547_s0 + $0x80] sm:$0xff]  ;;  %v262_v50 = vadd.f32 %v261_v43, %v260_v37  ;;  %v850_v51 = vmul.f32 %v105_v41, %v41_v40  ;;  %v45_v53 = vld [vmem:[%s1547_s0 + $0x90] sm:$0xff] }
   0xb   :  { %v222_v39 = vadd.f32 %v221_v34, %v791_v24  ;;  %v107_v49 = vld [vmem:[%s1548_s1 + $0x80] sm:$0xff]  ;;  %v109_v54 = vld [vmem:[%s1548_s1 + $0x90] sm:$0xff]  ;;  %v859_v55 = vmul.f32 %v100_v45, %v36_v44  ;;  %v263_v56 = vsel %vm257_vm1, %v831_v42, 0.0  ;;  %v38_v57 = vld [vmem:[%s1547_s0 + $0x58] sm:$0xff] }
   0xc   :  { %v102_v58 = vld [vmem:[%s1548_s1 + $0x58] sm:$0xff]  ;;  %v869_v59 = vmul.f32 %v107_v49, %v43_v48  ;;  %v40_v61 = vld [vmem:[%s1547_s0 + $0x68] sm:$0xff]  ;;  %v47_v62 = vld [vmem:[%s1547_s0 + $0xa0] sm:$0xff]  ;;  %v264_v2 = vadd.f32 %v263_v56, %v262_v50  ;;  %v890_v6 = vmul.f32 %v109_v54, %v45_v53 }
   0xd   :  { %v223_v47 = vadd.f32 %v222_v39, %v813_v33  ;;  %v111_v63 = vld [vmem:[%s1548_s1 + $0xa0] sm:$0xff]  ;;  %v42_v3 = vld [vmem:[%s1547_s0 + $0x78] sm:$0xff]  ;;  %v104_v4 = vld [vmem:[%s1548_s1 + $0x68] sm:$0xff]  ;;  %v899_v10 = vmul.f32 %v102_v58, %v38_v57  ;;  %v265_v11 = vsel %vm257_vm1, %v859_v55, 0.0 }
   0xe   :  { %v106_v5 = vld [vmem:[%s1548_s1 + $0x78] sm:$0xff]  ;;  %1578 = vst [vmem:[#allocation11_spill] sm:$0xff] %v890_v6  ;;  %v49_v8 = vld [vmem:[%s1547_s0 + $0xb0] sm:$0xff]  ;;  %v44_v12 = vld [vmem:[%s1547_s0 + $0x88] sm:$0xff]  ;;  %v909_v16 = vmul.f32 %v111_v63, %v47_v62  ;;  %v918_v23 = vmul.f32 %v104_v4, %v40_v61  ;;  %v266_v26 = vadd.f32 %v265_v11, %v264_v2 }
   0xf   :  { %v224_v52 = vadd.f32 %v223_v47, %v822_v38  ;;  %v113_v9 = vld [vmem:[%s1548_s1 + $0xb0] sm:$0xff]  ;;  %v108_v13 = vld [vmem:[%s1548_s1 + $0x88] sm:$0xff]  ;;  %v51_v18 = vld [vmem:[%s1547_s0 + $0xc0] sm:$0xff]  ;;  %v920_v25 = vmul.f32 %v106_v5, %v42_v3  ;;  %v267_v36 = vsel %vm257_vm1, %v899_v10, 0.0 }
  0x10   :  { %1579 = vst [vmem:[#allocation12_spill] sm:$0xff] %v909_v16  ;;  %v115_v22 = vld [vmem:[%s1548_s1 + $0xc0] sm:$0xff]  ;;  %v46_v27 = vld [vmem:[%s1547_s0 + $0x98] sm:$0xff]  ;;  %v928_v30 = vmul.f32 %v113_v9, %v49_v8  ;;  %v53_v32 = vld [vmem:[%s1547_s0 + $0xd0] sm:$0xff]  ;;  %v937_v35 = vmul.f32 %v108_v13, %v44_v12  ;;  %v268_v43 = vadd.f32 %v267_v36, %v266_v26 }
  0x11   :  { %v225_v60 = vadd.f32 %v224_v52, %v841_v46  ;;  %v110_v28 = vld [vmem:[%s1548_s1 + $0x98] sm:$0xff]  ;;  %v117_v34 = vld [vmem:[%s1548_s1 + $0xd0] sm:$0xff]  ;;  %v48_v37 = vld [vmem:[%s1547_s0 + $0xa8] sm:$0xff]  ;;  %v947_v40 = vmul.f32 %v115_v22, %v51_v18 }
  0x12   :  { %1580 = vst [vmem:[#allocation13_spill] sm:$0xff] %v928_v30  ;;  %v112_v39 = vld [vmem:[%s1548_s1 + $0xa8] sm:$0xff] }
  0x13   :  { %v226_v7 = vadd.f32 %v225_v60, %v850_v51  ;;  %1581 = vst [vmem:[#allocation14_spill] sm:$0xff] %v947_v40 }
  0x15   :  { %v227_v17 = vadd.f32 %v226_v7, %v869_v59 }
  0x17   :  { %v228_v31 = vadd.f32 %v227_v17, %v890_v6 }
  0x19   :  { %v229_v41 = vadd.f32 %v228_v31, %v909_v16 }
  0x1a   :  { %10 = vsyncpa [#allocation7], 0  ;;  %v55_v44 = vld [vmem:[%s1547_s0 + $0xe0] sm:$0xff]  ;;  %v956_v47 = vmul.f32 %v110_v28, %v46_v27  ;;  %v269_v48 = vsel %vm257_vm1, %v918_v23, 0.0  ;;  %v271_v49 = vsel %vm257_vm1, %v920_v25, 0.0  ;;  %v50_v50 = vld [vmem:[%s1547_s0 + $0xb8] sm:$0xff]  ;;  %v968_v53 = vmul.f32 %v117_v34, %v53_v32 }
  0x1b   :  { %v119_v45 = vld [vmem:[%s1548_s1 + $0xe0] sm:$0xff]  ;;  %v114_v52 = vld [vmem:[%s1548_s1 + $0xb8] sm:$0xff]  ;;  %v230_v54 = vadd.f32 %v229_v41, %v928_v30  ;;  %v270_v56 = vadd.f32 %v269_v48, %v268_v43  ;;  %v57_v57 = vld [vmem:[%s1547_s0 + $0xf0] sm:$0xff]  ;;  %v977_v60 = vmul.f32 %v112_v39, %v48_v37  ;;  %v273_v61 = vsel %vm257_vm1, %v937_v35, 0.0 }
  0x1c   :  { %1582 = vst [vmem:[#allocation15_spill] sm:$0xff] %v956_v47  ;;  %1583 = vst [vmem:[#allocation16_spill] sm:$0xff] %v968_v53  ;;  %v121_v58 = vld [vmem:[%s1548_s1 + $0xf0] sm:$0xff]  ;;  %v52_v62 = vld [vmem:[%s1547_s0 + $0xc8] sm:$0xff]  ;;  %v987_v2 = vmul.f32 %v119_v45, %v55_v44  ;;  %v996_v8 = vmul.f32 %v114_v52, %v50_v50  ;;  %v275_v9 = vsel %vm257_vm1, %v956_v47, 0.0  ;;  %vm556_vm2 = vcmask 1040384  }
  0x1d   :  { %1584 = vst [vmem:[#allocation17_spill] sm:$0xff] %v977_v60  ;;  %v116_v63 = vld [vmem:[%s1548_s1 + $0xc8] sm:$0xff]  ;;  %v231_v3 = vadd.f32 %v230_v54, %v947_v40  ;;  %v272_v4 = vadd.f32 %v271_v49, %v270_v56  ;;  %v59_v5 = vld [vmem:[%s1547_s0 + $0x100] sm:$0xff]  ;;  %v54_v11 = vld [vmem:[%s1547_s0 + $0xd8] sm:$0xff]  ;;  %v1006_v13 = vmul.f32 %v121_v58, %v57_v57  ;;  %v277_v28 = vsel %vm257_vm1, %v977_v60, 0.0 }
  0x1e   :  { %1585 = vst [vmem:[#allocation18_spill] sm:$0xff] %v987_v2  ;;  %v123_v7 = vld [vmem:[%s1548_s1 + $0x100] sm:$0xff]  ;;  %1586 = vst [vmem:[#allocation19_spill] sm:$0xff] %v996_v8  ;;  %v118_v12 = vld [vmem:[%s1548_s1 + $0xd8] sm:$0xff]  ;;  %v1015_v27 = vmul.f32 %v116_v63, %v52_v62  ;;  %v279_v44 = vsel %vm257_vm1, %v996_v8, 0.0  ;;  %vm558_vm3 = vcmask 942080  }
  0x1f   :  { %1587 = vst [vmem:[#allocation20_spill] sm:$0xff] %v1006_v13  ;;  %v232_v17 = vadd.f32 %v231_v3, %v968_v53  ;;  %v274_v18 = vadd.f32 %v273_v61, %v272_v4  ;;  %v61_v22 = vld [vmem:[%s1547_s0 + $0x110] sm:$0xff]  ;;  %v56_v31 = vld [vmem:[%s1547_s0 + $0xe8] sm:$0xff]  ;;  %v1025_v34 = vmul.f32 %v123_v7, %v59_v5  ;;  %v63_v39 = vld [vmem:[%s1547_s0 + $0x120] sm:$0xff]  ;;  %v1034_v43 = vmul.f32 %v118_v12, %v54_v11 }
  0x20   :  { %v125_v26 = vld [vmem:[%s1548_s1 + $0x110] sm:$0xff]  ;;  %1588 = vst [vmem:[#allocation21_spill] sm:$0xff] %v1015_v27  ;;  %v120_v32 = vld [vmem:[%s1548_s1 + $0xe8] sm:$0xff]  ;;  %v127_v41 = vld [vmem:[%s1548_s1 + $0x120] sm:$0xff]  ;;  %v281_v62 = vsel %vm257_vm1, %v1015_v27, 0.0  ;;  %vm611_vm4 = vcmask 0  }
  0x21   :  { %1589 = vst [vmem:[#allocation22_spill] sm:$0xff] %v1025_v34  ;;  %v233_v36 = vadd.f32 %v232_v17, %v987_v2  ;;  %v276_v37 = vadd.f32 %v275_v9, %v274_v18  ;;  %1590 = vst [vmem:[#allocation23_spill] sm:$0xff] %v1034_v43  ;;  %v58_v45 = vld [vmem:[%s1547_s0 + $0xf8] sm:$0xff]  ;;  %v60_v48 = vld [vmem:[%s1547_s0 + $0x108] sm:$0xff]  ;;  %v1047_v50 = vmul.f32 %v125_v26, %v61_v22 }
  0x22   :  { %v122_v49 = vld [vmem:[%s1548_s1 + $0xf8] sm:$0xff]  ;;  %v65_v57 = vld [vmem:[%s1547_s0 + $0x130] sm:$0xff]  ;;  %v1059_v61 = vmul.f32 %v120_v32, %v56_v31  ;;  %v64_v63 = vld [vmem:[%s1547_s0 + $0x128] sm:$0xff]  ;;  %v1078_v9 = vmul.f32 %v127_v41, %v63_v39  ;;  %v283_v31 = vsel %vm257_vm1, %v1034_v43, 0.0 }
  0x23   :  { %1591 = vst [vmem:[#allocation24_spill] sm:$0xff] %v1047_v50  ;;  %v234_v52 = vadd.f32 %v233_v36, %v1006_v13  ;;  %v278_v54 = vadd.f32 %v277_v28, %v276_v37  ;;  %v62_v56 = vld [vmem:[%s1547_s0 + $0x118] sm:$0xff]  ;;  %v129_v58 = vld [vmem:[%s1548_s1 + $0x130] sm:$0xff]  ;;  %v67_v4 = vld [vmem:[%s1547_s0 + $0x140] sm:$0xff]  ;;  %v1093_v28 = vmul.f32 %v122_v49, %v58_v45 }
  0x24   :  { %1592 = vst [vmem:[#allocation25_spill] sm:$0xff] %v1059_v61  ;;  %v66_v3 = vld [vmem:[%s1547_s0 + $0x138] sm:$0xff]  ;;  %v68_v5 = vld [vmem:[%s1547_s0 + $0x148] sm:$0xff]  ;;  %1593 = vst [vmem:[#allocation26_spill] sm:$0xff] %v1078_v9  ;;  %v1115_v45 = vmul.f32 %v129_v58, %v65_v57 }
  0x25   :  { %v124_v7 = vld [vmem:[%s1548_s1 + $0x108] sm:$0xff]  ;;  %v235_v11 = vadd.f32 %v234_v52, %v1025_v34  ;;  %v280_v12 = vadd.f32 %v279_v44, %v278_v54  ;;  %v69_v17 = vld [vmem:[%s1547_s0 + $0x150] sm:$0xff]  ;;  %v70_v18 = vld [vmem:[%s1547_s0 + $0x158] sm:$0xff]  ;;  %1594 = vst [vmem:[#allocation27_spill] sm:$0xff] %v1093_v28 }
  0x26   :  { %v126_v22 = vld [vmem:[%s1548_s1 + $0x118] sm:$0xff]  ;;  %v131_v26 = vld [vmem:[%s1548_s1 + $0x140] sm:$0xff]  ;;  %v72_v36 = vld [vmem:[%s1547_s0 + $0x168] sm:$0xff]  ;;  %1595 = vst [vmem:[#allocation28_spill] sm:$0xff] %v1115_v45  ;;  %v1130_v58 = vmul.f32 %v124_v7, %v60_v48 }
  0x27   :  { %v71_v32 = vld [vmem:[%s1547_s0 + $0x160] sm:$0xff]  ;;  %v73_v37 = vld [vmem:[%s1547_s0 + $0x170] sm:$0xff]  ;;  %v128_v39 = vld [vmem:[%s1548_s1 + $0x128] sm:$0xff]  ;;  %v236_v49 = vadd.f32 %v235_v11, %v1047_v50  ;;  %v282_v52 = vadd.f32 %v281_v62, %v280_v12  ;;  %v285_v62 = vsel %vm257_vm1, %v1059_v61, 0.0  ;;  %v1152_v13 = vmul.f32 %v126_v22, %v62_v56 }
  0x28   :  { %v130_v41 = vld [vmem:[%s1548_s1 + $0x138] sm:$0xff]  ;;  %v132_v44 = vld [vmem:[%s1548_s1 + $0x148] sm:$0xff]  ;;  %v75_v0 = vld [vmem:[%s1547_s0 + $0x180] sm:$0xff]  ;;  %1596 = vst [vmem:[#allocation29_spill] sm:$0xff] %v1130_v58  ;;  %v1154_v2 = vmul.f32 %v131_v26, %v67_v4  ;;  %v1169_v4 = vmul.f32 %v128_v39, %v64_v63 }
  0x29   :  { %v74_v54 = vld [vmem:[%s1547_s0 + $0x178] sm:$0xff]  ;;  %v133_v1 = vld [vmem:[%s1548_s1 + $0x150] sm:$0xff]  ;;  %v76_v11 = vld [vmem:[%s1547_s0 + $0x188] sm:$0xff]  ;;  %1597 = vst [vmem:[#allocation30_spill] sm:$0xff] %v1152_v13  ;;  %v237_v61 = vadd.f32 %v236_v49, %v1078_v9  ;;  %v284_v53 = vadd.f32 %v283_v31, %v282_v52  ;;  %v1171_v22 = vmul.f32 %v130_v41, %v66_v3  ;;  %v1173_v26 = vmul.f32 %v132_v44, %v68_v5 }
  0x2a   :  { %v134_v57 = vld [vmem:[%s1548_s1 + $0x158] sm:$0xff]  ;;  %v77_v12 = vld [vmem:[%s1547_s0 + $0x190] sm:$0xff]  ;;  %v135_v48 = vld [vmem:[%s1548_s1 + $0x160] sm:$0xff]  ;;  %1598 = vst [vmem:[#allocation31_spill] sm:$0xff] %v1154_v2  ;;  %v287_v31 = vsel %vm257_vm1, %v1093_v28, 0.0  ;;  %v1195_v41 = vmul.f32 %v133_v1, %v69_v17 }
  0x2b   :  { %v78_v50 = vld [vmem:[%s1547_s0 + $0x198] sm:$0xff]  ;;  %v136_v7 = vld [vmem:[%s1548_s1 + $0x168] sm:$0xff]  ;;  %v137_v34 = vld [vmem:[%s1548_s1 + $0x170] sm:$0xff]  ;;  %v1197_v44 = vmul.f32 %v134_v57, %v70_v18  ;;  %v238_v9 = vadd.f32 %v237_v61, %v1115_v45  ;;  %v286_v28 = vadd.f32 %v285_v62, %v284_v53  ;;  %v1212_v17 = vmul.f32 %v135_v48, %v71_v32 }
  0x2c   :  { %v79_v43 = vld [vmem:[%s1547_s0 + $0x1a0] sm:$0xff]  ;;  %v80_v40 = vld [vmem:[%s1547_s0 + $0x1a8] sm:$0xff]  ;;  %v138_v27 = vld [vmem:[%s1548_s1 + $0x178] sm:$0xff]  ;;  %v1214_v61 = vmul.f32 %v136_v7, %v72_v36  ;;  %v1216_v53 = vmul.f32 %v137_v34, %v73_v37  ;;  %v289_v18 = vsel %vm257_vm1, %v1130_v58, 0.0 }
  0x2d   :  { %v139_v56 = vld [vmem:[%s1548_s1 + $0x180] sm:$0xff]  ;;  %v81_v49 = vld [vmem:[%s1547_s0 + $0x1b0] sm:$0xff]  ;;  %v82_v52 = vld [vmem:[%s1547_s0 + $0x1b8] sm:$0xff]  ;;  %v1235_v37 = vmul.f32 %v138_v27, %v74_v54  ;;  %v239_v7 = vadd.f32 %v238_v9, %v1154_v2  ;;  %v288_v45 = vadd.f32 %v287_v31, %v286_v28  ;;  %v291_v9 = vsel %vm257_vm1, %v1152_v13, 0.0 }
  0x2e   :  { %v83_v63 = vld [vmem:[%s1547_s0 + $0x1c0] sm:$0xff]  ;;  %v140_v3 = vld [vmem:[%s1548_s1 + $0x188] sm:$0xff]  ;;  %v141_v5 = vld [vmem:[%s1548_s1 + $0x190] sm:$0xff]  ;;  %v1237_v48 = vmul.f32 %v139_v56, %v75_v0  ;;  %v293_v2 = vsel %vm257_vm1, %v1169_v4, 0.0 }
  0x2f   :  { %v142_v39 = vld [vmem:[%s1548_s1 + $0x198] sm:$0xff]  ;;  %v84_v30 = vld [vmem:[%s1547_s0 + $0x1c8] sm:$0xff]  ;;  %v85_v8 = vld [vmem:[%s1547_s0 + $0x1d0] sm:$0xff]  ;;  %v1249_v47 = vmul.f32 %v140_v3, %v76_v11  ;;  %v1251_v27 = vmul.f32 %v141_v5, %v77_v12  ;;  %v290_v31 = vadd.f32 %v289_v18, %v288_v45 }
  0x30   :  { %v143_v16 = vld [vmem:[%s1548_s1 + $0x1a0] sm:$0xff]  ;;  %v144_v1 = vld [vmem:[%s1548_s1 + $0x1a8] sm:$0xff]  ;;  %v86_v57 = vld [vmem:[%s1547_s0 + $0x1d8] sm:$0xff]  ;;  %v1253_v0 = vmul.f32 %v142_v39, %v78_v50  ;;  %v240_v50 = vadd.f32 %v239_v7, %v1195_v41 }
  0x31   :  { %v87_v62 = vld [vmem:[%s1547_s0 + $0x1e0] sm:$0xff]  ;;  %v145_v32 = vld [vmem:[%s1548_s1 + $0x1b0] sm:$0xff]  ;;  %v146_v34 = vld [vmem:[%s1548_s1 + $0x1b8] sm:$0xff]  ;;  %v1266_v56 = vmul.f32 %v143_v16, %v79_v43  ;;  %v1268_v12 = vmul.f32 %v144_v1, %v80_v40  ;;  %v292_v45 = vadd.f32 %v291_v9, %v290_v31 }
  0x32   :  { %v147_v36 = vld [vmem:[%s1548_s1 + $0x1c0] sm:$0xff]  ;;  %v88_v58 = vld [vmem:[%s1547_s0 + $0x1e8] sm:$0xff]  ;;  %v149_v6 = vld [vmem:[%s1548_s1 + $0x1d0] sm:$0xff]  ;;  %v1271_v3 = vmul.f32 %v145_v32, %v81_v49  ;;  %v1273_v5 = vmul.f32 %v146_v34, %v82_v52  ;;  %v241_v43 = vadd.f32 %v240_v50, %v1212_v17  ;;  %v297_v32 = vsel %vm257_vm1, %v1173_v26, 0.0 }
  0x33   :  { %v148_v60 = vld [vmem:[%s1548_s1 + $0x1c8] sm:$0xff]  ;;  %v150_v28 = vld [vmem:[%s1548_s1 + $0x1d8] sm:$0xff]  ;;  %v151_v54 = vld [vmem:[%s1548_s1 + $0x1e0] sm:$0xff]  ;;  %v1275_v39 = vmul.f32 %v147_v36, %v83_v63  ;;  %v1284_v40 = vmul.f32 %v149_v6, %v85_v8  ;;  %v294_v18 = vadd.f32 %v293_v2, %v292_v45  ;;  %v352_v34 = vmul.f32 %v766_v14, %v766_v14 }
  0x34   :  { %v152_v11 = vld [vmem:[%s1548_s1 + $0x1e8] sm:$0xff]  ;;  %v89_v13 = vld [vmem:[%s1547_s0 + $0x1f0] sm:$0xff]  ;;  %v1282_v16 = vmul.f32 %v148_v60, %v84_v30  ;;  %v90_v49 = vld [vmem:[%s1547_s0 + $0x1f8] sm:$0xff]  ;;  %v1296_v1 = vmul.f32 %v150_v28, %v86_v57  ;;  %v1298_v30 = vmul.f32 %v151_v54, %v87_v62  ;;  %v295_v60 = vsel %vm257_vm1, %v1171_v22, 0.0  ;;  %s702_s0 = smov [#allocation4]  }
  0x35   :  { %v153_v52 = vld [vmem:[%s1548_s1 + $0x1f0] sm:$0xff]  ;;  %v154_v63 = vld [vmem:[%s1548_s1 + $0x1f8] sm:$0xff]  ;;  %v1300_v6 = vmul.f32 %v152_v11, %v88_v58  ;;  %v242_v8 = vadd.f32 %v241_v43, %v1216_v53  ;;  %v353_v57 = vmul.f32 %v768_v15, %v768_v15  ;;  %v354_v62 = vmul.f32 %v779_v19, %v779_v19  ;;  %s620_s1 = sshll.u32 %s702_s0, 4  ;;  %s621_s1 = int_to_ptr.vmem [resolvable:$true] %s620_s1 }
  0x36   :  { %v355_v58 = vmul.f32 %v781_v20, %v781_v20  ;;  %v357_v36 = vmul.f32 %v803_v29, %v803_v29  ;;  %v1317_v7 = vmul.f32 %v153_v52, %v89_v13  ;;  %v1319_v2 = vmul.f32 %v154_v63, %v90_v49  ;;  %s652_s26 = scalar_lea.vmem %s621_s1, 16  ;;  %s656_s27 = scalar_lea.vmem %s621_s1, 32 }
  0x37   :  { %v243_v9 = vadd.f32 %v242_v8, %v1237_v48  ;;  %v296_v28 = vadd.f32 %v295_v60, %v294_v18  ;;  %v299_v14 = vsel %vm257_vm1, %v1197_v44, 0.0  ;;  %v301_v15 = vsel %vm257_vm1, %v1214_v61, 0.0  ;;  %p653_p0 = scmp.ne.s32.totalorder %s621_s1, %s652_s26  ;;  %p657_p1 = scmp.lt.s32.totalorder %s621_s1, %s621_s1 }
  0x38   :  { %v356_v19 = vmul.f32 %v783_v21, %v783_v21  ;;  %v359_v20 = vmul.f32 %v831_v42, %v831_v42  ;;  %v358_v54 = vmul.f32 %v791_v24, %v791_v24  ;;  %v361_v11 = vmul.f32 %v859_v55, %v859_v55  ;;  %p658_p2 = scmp.lt.s32.totalorder %s656_s27, %s652_s26 }
  0x39   :  { %v244_v29 = vadd.f32 %v243_v9, %v1251_v27  ;;  %v298_v13 = vadd.f32 %v297_v32, %v296_v28  ;;  %v416_v50 = vadd.f32 %v354_v62, %v352_v34  ;;  %v453_v31 = vsel %vm257_vm1, %v353_v57, 0.0 }
  0x3a   :  { %v454_v43 = vsel %vm257_vm1, %v355_v58, 0.0  ;;  %v456_v45 = vsel %vm257_vm1, %v357_v36, 0.0  ;;  %v303_v42 = vsel %vm257_vm1, %v1235_v37, 0.0  ;;  %v360_v24 = vmul.f32 %v813_v33, %v813_v33  ;;  %p659_p3 = por %p658_p2, %p657_p1 }
  0x3b   :  { %v245_v21 = vadd.f32 %v244_v29, %v1266_v56  ;;  %v300_v49 = vadd.f32 %v299_v14, %v298_v13  ;;  %v455_v52 = vadd.f32 %v454_v43, %v453_v31  ;;  %v363_v55 = vmul.f32 %v899_v10, %v899_v10 }
  0x3c   :  { %v417_v63 = vadd.f32 %v416_v50, %v356_v19  ;;  %v458_v60 = vsel %vm257_vm1, %v359_v20, 0.0  ;;  %v305_v32 = vsel %vm257_vm1, %v1249_v47, 0.0  ;;  %v362_v57 = vmul.f32 %v822_v38, %v822_v38  ;;  %p660_p4 = pnand %p659_p3, %p653_p0 }
  0x3d   :  { %v246_v8 = vadd.f32 %v245_v21, %v1271_v3  ;;  %v302_v18 = vadd.f32 %v301_v15, %v300_v49  ;;  %v457_v34 = vadd.f32 %v456_v45, %v455_v52  ;;  %v365_v62 = vmul.f32 %v918_v23, %v918_v23  ;;  %v1599_v49 = vld [vmem:[#allocation15_spill] sm:$0xff] }
  0x3e   :  { %v418_v33 = vadd.f32 %v417_v63, %v358_v54  ;;  %v460_v58 = vsel %vm257_vm1, %v361_v11, 0.0  ;;  %v307_v9 = vsel %vm257_vm1, %v1253_v0, 0.0  ;;  %v364_v14 = vmul.f32 %v841_v46, %v841_v46 }
  0x3f   :  { %v247_v10 = vadd.f32 %v246_v8, %v1275_v39  ;;  %v304_v36 = vadd.f32 %v303_v42, %v302_v18  ;;  %v459_v28 = vadd.f32 %v458_v60, %v457_v34  ;;  %v367_v15 = vmul.f32 %v920_v25, %v920_v25  ;;  %v1600_v60 = vld [vmem:[#allocation11_spill] sm:$0xff]  ;;  %v1601_v18 = vld [vmem:[#allocation17_spill] sm:$0xff] }
  0x40   :  { %v419_v38 = vadd.f32 %v418_v33, %v360_v24  ;;  %v462_v19 = vsel %vm257_vm1, %v363_v55, 0.0  ;;  %v309_v29 = vsel %vm257_vm1, %v1268_v12, 0.0  ;;  %v366_v54 = vmul.f32 %v850_v51, %v850_v51 }
  0x41   :  { %v248_v23 = vadd.f32 %v247_v10, %v1284_v40  ;;  %v306_v20 = vadd.f32 %v305_v32, %v304_v36  ;;  %v461_v13 = vadd.f32 %v460_v58, %v459_v28  ;;  %v369_v11 = vmul.f32 %v937_v35, %v937_v35  ;;  %v1602_v10 = vld [vmem:[#allocation12_spill] sm:$0xff] }
  0x42   :  { %v420_v46 = vadd.f32 %v419_v38, %v362_v57  ;;  %v464_v50 = vsel %vm257_vm1, %v365_v62, 0.0  ;;  %v311_v43 = vsel %vm257_vm1, %v1273_v5, 0.0  ;;  %v368_v21 = vmul.f32 %v869_v59, %v869_v59 }
  0x43   :  { %v249_v25 = vadd.f32 %v248_v23, %v1298_v30  ;;  %v308_v31 = vadd.f32 %v307_v9, %v306_v20  ;;  %v463_v45 = vadd.f32 %v462_v19, %v461_v13  ;;  %v371_v42 = vmul.f32 %v1599_v49, %v1599_v49  ;;  %v1603_v9 = vld [vmem:[#allocation19_spill] sm:$0xff] }
  0x44   :  { %v421_v51 = vadd.f32 %v420_v46, %v364_v14  ;;  %v466_v52 = vsel %vm257_vm1, %v367_v15, 0.0  ;;  %v313_v55 = vsel %vm257_vm1, %v1282_v16, 0.0  ;;  %v370_v8 = vmul.f32 %v1600_v60, %v1600_v60  ;;  %v1607_v49 = vld [vmem:[#allocation23_spill] sm:$0xff] }
  0x45   :  { %v250_v35 = vadd.f32 %v249_v25, %v1317_v7  ;;  %v310_v24 = vadd.f32 %v309_v29, %v308_v31  ;;  %v465_v63 = vadd.f32 %v464_v50, %v463_v45  ;;  %v373_v32 = vmul.f32 %v1601_v18, %v1601_v18  ;;  %v1604_v29 = vld [vmem:[#allocation13_spill] sm:$0xff]  ;;  %v1606_v45 = vld [vmem:[#allocation14_spill] sm:$0xff] }
  0x46   :  { %v422_v59 = vadd.f32 %v421_v51, %v366_v54  ;;  %v468_v34 = vsel %vm257_vm1, %v369_v11, 0.0  ;;  %v315_v33 = vsel %vm257_vm1, %v1296_v1, 0.0  ;;  %v372_v36 = vmul.f32 %v1602_v10, %v1602_v10  ;;  %v1605_v54 = vld [vmem:[#allocation21_spill] sm:$0xff] }
  0x47   :  { %v251_v57 = vrot.slane %v250_v35, 4  ;;  %v312_v62 = vadd.f32 %v311_v43, %v310_v24  ;;  %v467_v58 = vadd.f32 %v466_v52, %v465_v63  ;;  %v375_v28 = vmul.f32 %v1603_v9, %v1603_v9  ;;  %v1608_v63 = vld [vmem:[#allocation16_spill] sm:$0xff] }
  0x48   :  { %v423_v14 = vadd.f32 %v422_v59, %v368_v21  ;;  %v470_v15 = vsel %vm257_vm1, %v371_v42, 0.0  ;;  %v317_v23 = vsel %vm257_vm1, %v1300_v6, 0.0  ;;  %v374_v13 = vmul.f32 %v1604_v29, %v1604_v29 }
  0x49   :  { %v252_v38 = vadd.f32 %v251_v57, %v250_v35  ;;  %v314_v19 = vadd.f32 %v313_v55, %v312_v62  ;;  %v469_v20 = vadd.f32 %v468_v34, %v467_v58  ;;  %v377_v11 = vmul.f32 %v1605_v54, %v1605_v54  ;;  %v1610_v62 = vld [vmem:[#allocation18_spill] sm:$0xff]  ;;  %v1611_v58 = vld [vmem:[#allocation27_spill] sm:$0xff] }
  0x4a   :  { %v424_v46 = vadd.f32 %v423_v14, %v370_v8  ;;  %v472_v50 = vsel %vm257_vm1, %v373_v32, 0.0  ;;  %v319_v31 = vsel %vm257_vm1, %v1319_v2, 0.0  ;;  %v376_v21 = vmul.f32 %v1606_v45, %v1606_v45  ;;  %v1609_v8 = vld [vmem:[#allocation25_spill] sm:$0xff]  ;;  %v1615_v45 = vld [vmem:[#allocation30_spill] sm:$0xff] }
  0x4b   :  { %v316_v25 = vadd.f32 %v315_v33, %v314_v19  ;;  %v471_v43 = vadd.f32 %v470_v15, %v469_v20  ;;  %v379_v42 = vmul.f32 %v1607_v49, %v1607_v49  ;;  %v474_v52 = vsel %vm257_vm1, %v375_v28, 0.0  ;;  %v1612_v19 = vld [vmem:[#allocation20_spill] sm:$0xff]  ;;  %v1613_v20 = vld [vmem:[#allocation29_spill] sm:$0xff] }
  0x4c   :  { %v425_v51 = vadd.f32 %v424_v46, %v372_v36  ;;  %v253_v35 = vrot.slane %v252_v38, 2  ;;  %v378_v60 = vmul.f32 %v1608_v63, %v1608_v63  ;;  %v381_v18 = vmul.f32 %v1609_v8, %v1609_v8 }
  0x4d   :  { %v318_v24 = vadd.f32 %v317_v23, %v316_v25  ;;  %v473_v55 = vadd.f32 %v472_v50, %v471_v43  ;;  %v476_v59 = vsel %vm257_vm1, %v377_v11, 0.0  ;;  %v380_v33 = vmul.f32 %v1610_v62, %v1610_v62 }
  0x4e   :  { %v426_v32 = vadd.f32 %v425_v51, %v374_v13  ;;  %v383_v10 = vmul.f32 %v1611_v58, %v1611_v58  ;;  %v478_v9 = vsel %vm257_vm1, %v379_v42, 0.0  ;;  %v254_v28 = vadd.f32 %v253_v35, %v252_v38  ;;  %v1616_v35 = vld [vmem:[#allocation24_spill] sm:$0xff] }
  0x4f   :  { %v320_v34 = vadd.f32 %v319_v31, %v318_v24  ;;  %v475_v57 = vadd.f32 %v474_v52, %v473_v55  ;;  %v382_v23 = vmul.f32 %v1612_v19, %v1612_v19  ;;  %v385_v29 = vmul.f32 %v1613_v20, %v1613_v20  ;;  %v1614_v31 = vld [vmem:[#allocation22_spill] sm:$0xff] }
  0x50   :  { %v427_v36 = vadd.f32 %v426_v32, %v376_v21  ;;  %v480_v54 = vsel %vm257_vm1, %v381_v18, 0.0  ;;  %v701_v46 = vmov 1966171168   ;;  %v384_v43 = vmul.f32 %v1614_v31, %v1614_v31 }
  0x51   :  { %v321_v14 = vrot.slane %v320_v34, 4  ;;  %v477_v15 = vadd.f32 %v476_v59, %v475_v57  ;;  %v331_v50 = vunpack.c.l.s4 %v701_v46  ;;  %v387_v38 = vmul.f32 %v1615_v45, %v1615_v45  ;;  %v1618_v57 = vld [vmem:[#allocation26_spill] sm:$0xff] }
  0x52   :  { %v428_v13 = vadd.f32 %v427_v36, %v378_v60  ;;  %v482_v49 = vsel %vm257_vm1, %v383_v10, 0.0  ;;  %v255_v42 = vrot.slane %v254_v28, 1  ;;  %v386_v24 = vmul.f32 %v1616_v35, %v1616_v35 }
  0x53   :  { %v322_v11 = vadd.f32 %v321_v14, %v320_v34  ;;  %v479_v25 = vadd.f32 %v478_v9, %v477_v15  ;;  %v389_v55 = vmul.f32 %v1169_v4, %v1169_v4  ;;  %v484_v60 = vsel %vm257_vm1, %v385_v29, 0.0  ;;  %v1619_v14 = vld [vmem:[#allocation28_spill] sm:$0xff] }
  0x54   :  { %v429_v21 = vadd.f32 %v428_v13, %v380_v33  ;;  %v332_v18 = vunpack.c.0.s8 %v331_v50  ;;  %v1617_v32 = vlaneseq  ;;  %v388_v62 = vmul.f32 %v1618_v57, %v1618_v57 }
  0x55   :  { %v323_v51 = vrot.slane %v322_v11, 2  ;;  %v481_v52 = vadd.f32 %v480_v54, %v479_v25  ;;  %v391_v33 = vmul.f32 %v1171_v22, %v1171_v22  ;;  %v486_v10 = vsel %vm257_vm1, %v387_v38, 0.0  ;;  %v1620_v54 = vld [vmem:[#allocation31_spill] sm:$0xff] }
  0x56   :  { %v430_v63 = vadd.f32 %v429_v21, %v382_v23  ;;  %v1433_v59 = vshrl.u32 %v1617_v32, 7  ;;  %v256_v36 = vadd.f32 %v255_v42, %v254_v28  ;;  %v390_v15 = vmul.f32 %v1619_v14, %v1619_v14  ;;  %v219_v42 = vld [vmem:[#allocation2] sm:$0x3] }
  0x57   :  { %v324_v8 = vadd.f32 %v323_v51, %v322_v11  ;;  %v483_v34 = vadd.f32 %v482_v49, %v481_v52  ;;  %v393_v19 = vmul.f32 %v1173_v26, %v1173_v26  ;;  %v488_v20 = vsel %vm257_vm1, %v389_v55, 0.0 }
  0x58   :  { %v431_v58 = vadd.f32 %v430_v63, %v384_v43  ;;  %v1446_v13 = vsub.s32 %v332_v18, %v1433_v59  ;;  %v392_v11 = vmul.f32 %v1620_v54, %v1620_v54  ;;  %v395_v28 = vmul.f32 %v1197_v44, %v1197_v44 }
  0x59   :  { %v325_v4 = vrot.slane %v324_v8, 1  ;;  %v485_v9 = vadd.f32 %v484_v60, %v483_v34  ;;  %v490_v50 = vsel %vm257_vm1, %v391_v33, 0.0  ;;  %v394_v26 = vmul.f32 %v1195_v41, %v1195_v41 }
  0x5a   :  { %v432_v23 = vadd.f32 %v431_v58, %v386_v24  ;;  %v397_v43 = vmul.f32 %v1214_v61, %v1214_v61  ;;  %v492_v38 = vsel %vm257_vm1, %v393_v19, 0.0  ;;  %v396_v44 = vmul.f32 %v1212_v17, %v1212_v17 }
  0x5b   :  { %v326_v29 = vadd.f32 %v325_v4, %v324_v8  ;;  %v487_v22 = vadd.f32 %v486_v10, %v485_v9  ;;  %v399_v51 = vmul.f32 %v1235_v37, %v1235_v37  ;;  %v494_v35 = vsel %vm257_vm1, %v395_v28, 0.0 }
  0x5c   :  { %v433_v46 = vadd.f32 %v432_v23, %v388_v62  ;;  %v398_v61 = vmul.f32 %v1216_v53, %v1216_v53  ;;  %v401_v55 = vmul.f32 %v1249_v47, %v1249_v47  ;;  %v496_v60 = vsel %vm257_vm1, %v397_v43, 0.0 }
  0x5d   :  { %v329_v25 = vcombine.low %v256_v36, %v326_v29  ;;  %v489_v31 = vadd.f32 %v488_v20, %v487_v22  ;;  %v400_v37 = vmul.f32 %v1237_v48, %v1237_v48  ;;  %v403_v18 = vmul.f32 %v1253_v0, %v1253_v0 }
  0x5e   :  { %v434_v45 = vadd.f32 %v433_v46, %v390_v15  ;;  %v498_v34 = vsel %vm257_vm1, %v399_v51, 0.0  ;;  %v402_v47 = vmul.f32 %v1251_v27, %v1251_v27  ;;  %v405_v62 = vmul.f32 %v1268_v12, %v1268_v12 }
  0x5f   :  { %v336_v21 = vrot.slane %v329_v25, %v1446_v13  ;;  %v491_v49 = vadd.f32 %v490_v50, %v489_v31  ;;  %v500_v58 = vsel %vm257_vm1, %v401_v55, 0.0  ;;  %v404_v0 = vmul.f32 %v1266_v56, %v1266_v56 }
  0x60   :  { %v435_v52 = vadd.f32 %v434_v45, %v392_v11  ;;  %v407_v10 = vmul.f32 %v1273_v5, %v1273_v5  ;;  %v502_v4 = vsel %vm257_vm1, %v403_v18, 0.0  ;;  %v548_v14 = vsub.s32 0, %v1433_v59 }
  0x61   :  { %v343_v41 = vrot.slane %v336_v21, %v1446_v13  ;;  %v493_v24 = vadd.f32 %v492_v38, %v491_v49  ;;  %v552_v27 = vsub.s32 1, %v1433_v59  ;;  %v406_v12 = vmul.f32 %v1271_v3, %v1271_v3 }
  0x62   :  { %v436_v63 = vadd.f32 %v435_v52, %v394_v26  ;;  %v409_v15 = vmul.f32 %v1282_v16, %v1282_v16  ;;  %v504_v56 = vsel %vm257_vm1, %v405_v62, 0.0  ;;  %v408_v5 = vmul.f32 %v1275_v39, %v1275_v39 }
  0x63   :  { %v345_v8 = vadd.f32 %v343_v41, %v219_v42  ;;  %v495_v17 = vadd.f32 %v494_v35, %v493_v24  ;;  %v411_v23 = vmul.f32 %v1296_v1, %v1296_v1  ;;  %v506_v22 = vsel %vm257_vm1, %v407_v10, 0.0 }
  0x64   :  { %v437_v32 = vadd.f32 %v436_v63, %v396_v44  ;;  %v410_v16 = vmul.f32 %v1284_v40, %v1284_v40  ;;  %v413_v28 = vmul.f32 %v1300_v6, %v1300_v6  ;;  %v508_v46 = vsel %vm257_vm1, %v409_v15, 0.0 }
  0x65   :  { %350 = vst.msk [vmem:[#allocation2] sm:$0x3] %vm725_vm0, %v345_v8  ;;  %v497_v53 = vadd.f32 %v496_v60, %v495_v17  ;;  %v412_v1 = vmul.f32 %v1298_v30, %v1298_v30  ;;  %v415_v26 = vmul.f32 %v1319_v2, %v1319_v2  ;;  %v510_v40 = vsel %vm257_vm1, %v411_v23, 0.0 }
  0x66   :  { %v438_v33 = vadd.f32 %v437_v32, %v398_v61  ;;  %v414_v6 = vmul.f32 %v1317_v7, %v1317_v7  ;;  %v512_v49 = vsel %vm257_vm1, %v413_v28, 0.0 }
  0x67   :  { %v499_v48 = vadd.f32 %v498_v34, %v497_v53  ;;  %v514_v44 = vsel %vm257_vm1, %v415_v26, 0.0  ;;  %v351_v53 = vld [vmem:[#allocation3] sm:$0x3] }
  0x68   :  { %v439_v36 = vadd.f32 %v438_v33, %v400_v37 }
  0x69   :  { %v501_v9 = vadd.f32 %v500_v58, %v499_v48 }
  0x6a   :  { %v440_v19 = vadd.f32 %v439_v36, %v402_v47 }
  0x6b   :  { %v503_v20 = vadd.f32 %v502_v4, %v501_v9 }
  0x6c   :  { %v441_v29 = vadd.f32 %v440_v19, %v404_v0  ;;  %v544_v59 = vld [vmem:[#allocation2] sm:$0x3] }
  0x6d   :  { %v505_v3 = vadd.f32 %v504_v56, %v503_v20  ;;  %v549_v54 = vrot.slane %v544_v59, %v548_v14  ;;  %v553_v11 = vrot.slane %v544_v59, %v552_v27 }
  0x6e   :  { %v442_v39 = vadd.f32 %v441_v29, %v406_v12 }
  0x6f   :  { %v507_v50 = vadd.f32 %v506_v22, %v505_v3  ;;  %v557_v25 = vsel %vm556_vm2, %v549_v54, 0.0  ;;  %v559_v31 = vsel %vm558_vm3, %v553_v11, 0.0 }
  0x70   :  { %v443_v43 = vadd.f32 %v442_v39, %v408_v5  ;;  %v560_v45 = vadd.f32 %v559_v31, %v557_v25 }
  0x71   :  { %v509_v38 = vadd.f32 %v508_v46, %v507_v50 }
  0x72   :  { %v444_v21 = vadd.f32 %v443_v43, %v410_v16  ;;  %561 = vadd.xlane.f32.xlu0 %v560_v45 }
  0x73   :  { %v511_v30 = vadd.f32 %v510_v40, %v509_v38 }
  0x74   :  { %v445_v42 = vadd.f32 %v444_v21, %v412_v1 }
  0x75   :  { %v513_v51 = vadd.f32 %v512_v49, %v511_v30 }
  0x76   :  { %v446_v52 = vadd.f32 %v445_v42, %v414_v6 }
  0x77   :  { %v515_v35 = vadd.f32 %v514_v44, %v513_v51 }
  0x78   :  { %v447_v2 = vrot.slane %v446_v52, 4 }
  0x79   :  { %v516_v41 = vrot.slane %v515_v35, 4 }
  0x7a   :  { %v448_v24 = vadd.f32 %v447_v2, %v446_v52 }
  0x7b   :  { %v517_v61 = vadd.f32 %v516_v41, %v515_v35 }
  0x7c   :  { %v449_v55 = vrot.slane %v448_v24, 2 }
  0x7d   :  { %v518_v63 = vrot.slane %v517_v61, 2 }
  0x7e   :  { %v450_v60 = vadd.f32 %v449_v55, %v448_v24 }
  0x7f   :  { %v519_v8 = vadd.f32 %v518_v63, %v517_v61 }
  0x80   :  { %v451_v7 = vrot.slane %v450_v60, 1 }
  0x81   :  { %v520_v17 = vrot.slane %v519_v8, 1 }
  0x82   :  { %v452_v37 = vadd.f32 %v451_v7, %v450_v60 }
  0x83   :  { %v521_v18 = vadd.f32 %v520_v17, %v519_v8 }
  0x85   :  { %v524_v32 = vcombine.low %v452_v37, %v521_v18 }
  0x87   :  { %v531_v34 = vrot.slane %v524_v32, %v1446_v13 }
  0x89   :  { %v538_v47 = vrot.slane %v531_v34, %v1446_v13 }
  0x8b   :  { %v540_v62 = vadd.f32 %v538_v47, %v351_v53 }
  0x8d   :  { %541 = vst.msk [vmem:[#allocation3] sm:$0x3] %vm725_vm0, %v540_v62 }
  0x94   :  { %v571_v33 = vld [vmem:[#allocation3] sm:$0x3] }
  0x95   :  { %v576_v58 = vrot.slane %v571_v33, %v548_v14  ;;  %v580_v48 = vrot.slane %v571_v33, %v552_v27 }
  0x97   :  { %v583_v0 = vsel %vm556_vm2, %v576_v58, 0.0  ;;  %v584_v10 = vsel %vm558_vm3, %v580_v48, 0.0 }
  0x98   :  { %v585_v36 = vadd.f32 %v584_v10, %v583_v0 }
  0x9a   :  { %586 = vadd.xlane.f32.xlu0 %v585_v36 }
  0xff   :  { %v562_v4 = vpop.xlane.xlu0 %561 }
 0x100   :  { %v563_v9 = vrot.slane %v562_v4, 4 }
 0x102   :  { %v564_v12 = vadd.f32 %v563_v9, %v562_v4 }
 0x104   :  { %v565_v15 = vrot.slane %v564_v12, 2 }
 0x106   :  { %v566_v19 = vadd.f32 %v565_v15, %v564_v12 }
 0x108   :  { %v567_v56 = vrot.slane %v566_v19, 1 }
 0x10a   :  { %v568_v13 = vadd.f32 %v567_v56, %v566_v19 }
 0x10c   :  { %642 = vpush %v568_v13 }
 0x127   :  { %v587_v5 = vpop.xlane.xlu0 %586 }
 0x128   :  { %v588_v57 = vrot.slane %v587_v5, 4 }
 0x12a   :  { %v589_v23 = vadd.f32 %v588_v57, %v587_v5 }
 0x12c   :  { %v590_v20 = vrot.slane %v589_v23, 2 }
 0x12e   :  { %v591_v14 = vadd.f32 %v590_v20, %v589_v23 }
 0x130   :  { %v592_v27 = vrot.slane %v591_v14, 1 }
 0x132   :  { %v593_v29 = vadd.f32 %v592_v27, %v591_v14 }
 0x134   :  { %644 = vpush %v593_v29 }
 0x13d   :  { %s643_s25 = spop %642 }
 0x13e   :  { %v570_v22 = vstv %s643_s25 }
 0x13f   :  { %v597_v59 = vmul.f32 1.600922e-05, %v570_v22 }
 0x141   :  { %612 = vst.msk [vmem:[#allocation4] sm:$0x1] %vm611_vm4, %v597_v59 }
 0x142   :  { %663 = shalt.err (!%p660_p4)
}
 0x143   :  { %s664_s30 = scalar_lea.hbm %s1549_s2, 16 }
 0x144   :  { %p665_p5 = scmp.ne.s32.totalorder %s1549_s2, %s664_s30  ;;  %p668_p6 = scmp.lt.u32.totalorder %s664_s30, %s1549_s2 }
 0x146   :  { %p670_p7 = pnand %p668_p6, %p665_p5 }
 0x148   :  { %673 = shalt.err (!%p670_p7)
}
 0x149   :  { %623 = dma.vmem_to_hbm [thread:$0]  %s621_s1, 16, %s1549_s2, [#allocation5]   ;;  %v598_v3 = vmul.f32 62464.0, %v597_v59 }
 0x14a   :  { %s703_s11 = smov [#allocation6]  }
 0x14b   :  { %v599_v54 = vmul.f32 %v598_v3, %v597_v59  ;;  %s630_s12 = sshll.u32 %s703_s11, 4  ;;  %s631_s12 = int_to_ptr.vmem [resolvable:$true] %s630_s12 }
 0x14c   :  { %s674_s2 = scalar_lea.vmem %s631_s12, 16  ;;  %s678_s13 = scalar_lea.vmem %s631_s12, 32 }
 0x14d   :  { %p675_p8 = scmp.ne.s32.totalorder %s631_s12, %s674_s2  ;;  %p679_p9 = scmp.lt.s32.totalorder %s631_s12, %s631_s12 }
 0x14e   :  { %p680_p10 = scmp.lt.s32.totalorder %s678_s13, %s674_s2 }
 0x150   :  { %p681_p11 = por %p680_p10, %p679_p9 }
 0x152   :  { %p682_p12 = pnand %p681_p11, %p675_p8 }
 0x165   :  { %s645_s10 = spop %644 }
 0x166   :  { %v595_v11 = vstv %s645_s10 }
 0x167   :  { %v600_v16 = vsub.f32 %v595_v11, %v599_v54 }
 0x169   :  { %v602_v28 = vmul.f32 1.6009477e-05, %v600_v16 }
 0x16b   :  { %v603_v39 = vmax.f32 %v602_v28, 0.0 }
 0x16d   :  { %650 = vrsqrt.f32 %v603_v39  ;;  %vm606_vm5 = vcmp.eq.f32.partialorder %v603_v39, inf  ;;  %v609_v50 = vand.u32 2147483648, %v603_v39  ;;  %vm608_vm6 = vcmp.eq.f32.partialorder %v603_v39, 0.0 }
 0x177   :  { %v651_v46 = vpop.eup %650 }
 0x178   :  { %v605_v1 = vmul.f32 %v651_v46, %v603_v39 }
 0x17a   :  { %v607_v25 = vsel %vm606_vm5, %v603_v39, %v605_v1 }
 0x17b   :  { %v610_v31 = vsel %vm608_vm6, %v609_v50, %v607_v25 }
 0x17c   :  { %613 = vst.msk [vmem:[#allocation6] sm:$0x1] %vm611_vm4, %v610_v31 }
 0x17d   :  { %685 = shalt.err (!%p682_p12)
}
 0x17e   :  { %s686_s16 = scalar_lea.hbm %s1550_s3, 16 }
 0x17f   :  { %p687_p13 = scmp.ne.s32.totalorder %s1550_s3, %s686_s16  ;;  %p690_p0 = scmp.lt.u32.totalorder %s686_s16, %s1550_s3 }
 0x181   :  { %p692_p1 = pnand %p690_p0, %p687_p13 }
 0x183   :  { %695 = shalt.err (!%p692_p1)
}
 0x184   :  { %633 = dma.vmem_to_hbm [thread:$0]  %s631_s12, 16, %s1550_s3, [#allocation7]  }
 0x185   :  { %696 = dma.done.wait [#allocation5], 16  }
 0x186   :  { %697 = vsyncadd [#allocation5], 4294967280 }
 0x187   :  { %698 = dma.done.wait [#allocation7], 16  }
 0x188   :  { %699 = vsyncadd [#allocation7], 4294967280 }
 0x189   :  { %640 = vsyncpa [#allocation5], 1 }
 0x18a   :  { %641 = vsyncpa [#allocation7], 1 }

</bundles_post_ra>
